<compile_context>
chip_gen: v5e
topology: v5e:2x2
jax: 0.10.0
libtpu: 0.0.40
codegen_flags: <defaults>
</compile_context>

<pallas_src>
import jax
import jax.numpy as jnp
import numpy as np
from jax import lax
from jax.experimental import pallas as pl
from jax.experimental.pallas import tpu as pltpu


def afm_kernel(x_ref, y_ref, wf_ref, bf_ref, out_ref):
    # x_ref, y_ref, out_ref : (tile_n, S*C)  NHWC-flattened bf16 tiles
    # wf_ref                : (S*C, C)       fused conv1@conv2 weight, bf16
    # bf_ref                : (1, C)         fused bias, f32
    _, SC = x_ref.shape
    C = wf_ref.shape[1]
    S = SC // C

    w = wf_ref[...]
    b = bf_ref[...]

    # Two MXU contractions (K = S*C) sharing the VMEM-resident RHS -- no sublane
    # concat copy of the two branches.  bf16 operands, f32 accumulation.
    logits_x = jnp.dot(x_ref[...], w, preferred_element_type=jnp.float32) + b
    logits_y = jnp.dot(y_ref[...], w, preferred_element_type=jnp.float32) + b

    # Sigmoid; the divide runs on the otherwise-idle EUP slot.
    gx = pl.reciprocal(1.0 + jnp.exp(-logits_x), approx=True)   # (tile_n, C) f32
    gy = pl.reciprocal(1.0 + jnp.exp(-logits_y), approx=True)

    # Broadcast the 1x1 gate over the S spatial taps with per-tap static-slice
    # FMAs (no (tile_n, S*C) broadcast temporaries; slices are static views).
    for s in range(S):
        sl = slice(s * C, (s + 1) * C)
        xs = x_ref[:, sl].astype(jnp.float32)
        ys = y_ref[:, sl].astype(jnp.float32)
        out_ref[:, sl] = (gx * xs + gy * ys).astype(out_ref.dtype)


def _vmem_limit_bytes():
    """Scoped-VMEM limit adapted to the chip: ~3/4 of physical, capped at 96 MiB.
    -> 96 MiB on v5e/v6e (128 MiB physical), 48 MiB on v7x (64 MiB physical)."""
    try:
        info = pltpu.get_tpu_info()
        phys = getattr(info, "vmem_capacity_bytes", None) or (64 << 20)
    except Exception:
        phys = 64 << 20  # conservative fallback (covers v7x)
    return max(32 << 20, min(int(phys * 3 // 4), 96 << 20))


def _pick_tile_n(n, row_bytes, vmem_budget, min_steps=4):
    """Largest batch tile that divides N, is a multiple of 8 (sublane tiling),
    keeps the double-buffered x/y/out footprint inside the VMEM budget, and --
    when N allows -- leaves at least `min_steps` grid steps so the HBM pipeline
    stays fed and both v7x TensorCores get work."""
    cands = [t for t in range(8, n + 1, 8) if n % t == 0]
    if not cands:
        return n  # tiny N: one full-batch block (block dim == array dim)
    fitting = [t for t in cands if 2 * t * row_bytes <= vmem_budget] or [cands[0]]
    for steps in (min_steps, 2, 1):
        ok = [t for t in fitting if n // t >= steps]
        if ok:
            return max(ok)
    return fitting[0]


def afm_pallas(x_nchw, y_nchw, w1, b1, w2, b2, *, tile_n=None):
    """x_nchw, y_nchw: (N, C, 3, 3); w1: (C, C, 3, 3); b1: (C,); w2: (C, C, 1, 1); b2: (C,)."""
    N, C, H, W = x_nchw.shape
    assert (H, W) == (3, 3), "AFM broadcast semantics require 3x3 spatial inputs"
    assert w1.shape == (C, C, 3, 3) and w2.shape == (C, C, 1, 1), (
        "AFM requires in_channles == num_channles"
    )
    S = H * W
    SC = S * C

    # NCHW -> (N, H*W*C) bf16; flat index = h*(W*C) + w*C + c.
    # (See TODO(synk) at the top: keep this layout end-to-end in production.)
    to_2d = lambda t: (
        jnp.transpose(t, (0, 2, 3, 1)).reshape(N, SC).astype(jnp.bfloat16)
    )
    x2d = to_2d(x_nchw)
    y2d = to_2d(y_nchw)

    # Fuse conv1 (3x3 VALID) and conv2 (1x1) -- no nonlinearity between them:
    #   Wf[(h,w,ic), oc] = sum_mc w2[oc, mc] * w1[mc, ic, h, w]
    #   bf[oc]           = sum_mc w2[oc, mc] * b1[mc] + b2[oc]
    w2_2d = w2[:, :, 0, 0]                                             # (OC, MC)
    wf = (jnp.transpose(w1, (2, 3, 1, 0)).reshape(SC, C) @ w2_2d.T)    # (S*C, OC)
    wf = wf.astype(jnp.bfloat16)
    bf = (b1 @ w2_2d.T + b2).reshape(1, C).astype(jnp.float32)

    vmem_limit = _vmem_limit_bytes()
    if tile_n is None:
        # Budget: double-buffered x/y/out tiles + (double-buffered) resident
        # weight/bias, with headroom for compiler scratch.
        weight_bytes = 2 * (SC * C * 2 + C * 4)
        row_bytes = SC * (2 + 2 + 2)  # x, y inputs + output, all bf16
        budget = max(int(0.8 * vmem_limit) - weight_bytes, 2 * 8 * row_bytes)
        tile_n = _pick_tile_n(N, row_bytes, budget)
    assert N % tile_n == 0
    grid = (N // tile_n,)

    out2d = pl.pallas_call(
        afm_kernel,
        out_shape=jax.ShapeDtypeStruct((N, SC), jnp.bfloat16),
        grid_spec=pltpu.PrefetchScalarGridSpec(
            num_scalar_prefetch=0,
            grid=grid,
            in_specs=[
                pl.BlockSpec((tile_n, SC), lambda i: (i, 0)),
                pl.BlockSpec((tile_n, SC), lambda i: (i, 0)),
                pl.BlockSpec((SC, C), lambda i: (0, 0)),   # weights stay VMEM-resident
                pl.BlockSpec((1, C), lambda i: (0, 0)),
            ],
            out_specs=pl.BlockSpec((tile_n, SC), lambda i: (i, 0)),
        ),
        compiler_params=pltpu.CompilerParams(
            dimension_semantics=("parallel",),   # shards across the 2 TCs on v7x
            vmem_limit_bytes=vmem_limit,
        ),
    )(x2d, y2d, wf, bf)

    # (N, H*W*C) bf16 -> NCHW f32 (module output dtype).
    return jnp.transpose(out2d.reshape(N, H, W, C), (0, 3, 1, 2)).astype(jnp.float32)


def afm_reference(x, y, w1, b1, w2, b2):
    """Plain-JAX f32 reference mirroring the PyTorch forward (NCHW convs)."""
    dn = ("NCHW", "OIHW", "NCHW")

    def branch(t):
        h = lax.conv_general_dilated(t, w1, (1, 1), "VALID", dimension_numbers=dn)
        h = h + b1.reshape(1, -1, 1, 1)
        h = lax.conv_general_dilated(h, w2, (1, 1), "VALID", dimension_numbers=dn)
        h = h + b2.reshape(1, -1, 1, 1)
        return jax.nn.sigmoid(h)  # (N, C, 1, 1)

    return branch(x) * x + branch(y) * y  # 1x1 gate broadcasts over the 3x3 input


if __name__ == "__main__":
    N, C, H, W = 16, 32, 3, 3  # in_channles == num_channles == C is required

    key = jax.random.PRNGKey(0)
    kx, ky, kw1, kb1, kw2, kb2 = jax.random.split(key, 6)

    x = jax.random.normal(kx, (N, C, H, W), dtype=jnp.float32)
    y = jax.random.normal(ky, (N, C, H, W), dtype=jnp.float32)

    # Deterministic synthetic parameters (PyTorch-style uniform(-1/sqrt(fan_in), ..)).
    fan1 = C * 3 * 3
    fan2 = C * 1 * 1
    w1 = jax.random.uniform(kw1, (C, C, 3, 3), jnp.float32, -1.0, 1.0) / np.sqrt(fan1)
    b1 = jax.random.uniform(kb1, (C,), jnp.float32, -1.0, 1.0) / np.sqrt(fan1)
    w2 = jax.random.uniform(kw2, (C, C, 1, 1), jnp.float32, -1.0, 1.0) / np.sqrt(fan2)
    b2 = jax.random.uniform(kb2, (C,), jnp.float32, -1.0, 1.0) / np.sqrt(fan2)

    out = jax.block_until_ready(afm_pallas(x, y, w1, b1, w2, b2))
    ref = jax.block_until_ready(afm_reference(x, y, w1, b1, w2, b2))

    # bf16 inputs/weights/output + fused conv weights + approx reciprocal sigmoid
    # => inference-grade tolerance vs. the bit-exact f32 reference (mathematically
    # equivalent formulation).
    np.testing.assert_allclose(np.asarray(out), np.asarray(ref), rtol=5e-2, atol=5e-2)

    print("KERNEL_OK")
</pallas_src>

<mosaic_0001>
module attributes {stable_mosaic.version = 11 : i64} {
  func.func @afm_kernel(%arg0: i32, %arg1: memref<8x288xbf16, #tpu.memory_space<vmem>>, %arg2: memref<8x288xbf16, #tpu.memory_space<vmem>>, %arg3: memref<288x32xbf16, #tpu.memory_space<vmem>>, %arg4: memref<1x32xf32, #tpu.memory_space<vmem>>, %arg5: memref<8x288xbf16, #tpu.memory_space<vmem>>) attributes {dimension_semantics = [#tpu.dimension_semantics<parallel>], iteration_bounds = array<i64: 2>, scalar_prefetch = 0 : i64, scratch_operands = 0 : i64, tpu.core_type = #tpu.core_type<tc>, window_params = [{transform_indices = @transform_0, window_bounds = array<i64: 8, 288>}, {transform_indices = @transform_1, window_bounds = array<i64: 8, 288>}, {pipeline_mode = #tpu.pipeline_mode<synchronous>, transform_indices = @transform_2, window_bounds = array<i64: 288, 32>}, {pipeline_mode = #tpu.pipeline_mode<synchronous>, transform_indices = @transform_3, window_bounds = array<i64: 1, 32>}, {transform_indices = @transform_4, window_bounds = array<i64: 8, 288>}]} {
    %c0 = arith.constant 0 : index
    %c0_0 = arith.constant 0 : index
    %0 = vector.load %arg3[%c0, %c0_0] : memref<288x32xbf16, #tpu.memory_space<vmem>>, vector<288x32xbf16>
    %c0_1 = arith.constant 0 : index
    %c0_2 = arith.constant 0 : index
    %1 = vector.load %arg4[%c0_1, %c0_2] : memref<1x32xf32, #tpu.memory_space<vmem>>, vector<1x32xf32>
    %c0_3 = arith.constant 0 : index
    %c0_4 = arith.constant 0 : index
    %2 = vector.load %arg1[%c0_3, %c0_4] : memref<8x288xbf16, #tpu.memory_space<vmem>>, vector<8x288xbf16>
    %cst = arith.constant dense<0.000000e+00> : vector<8x32xf32>
    %3 = tpu.matmul %2, %0, %cst {dimension_numbers = #tpu.dot_dimension_numbers<[1], [0], [0], [1], [0, 0, 1, 1], [], []>} : vector<8x288xbf16>, vector<288x32xbf16>, vector<8x32xf32> -> vector<8x32xf32>
    %4 = vector.broadcast %1 : vector<1x32xf32> to vector<8x32xf32>
    %5 = arith.addf %3, %4 : vector<8x32xf32>
    %c0_5 = arith.constant 0 : index
    %c0_6 = arith.constant 0 : index
    %6 = vector.load %arg2[%c0_5, %c0_6] : memref<8x288xbf16, #tpu.memory_space<vmem>>, vector<8x288xbf16>
    %cst_7 = arith.constant dense<0.000000e+00> : vector<8x32xf32>
    %7 = tpu.matmul %6, %0, %cst_7 {dimension_numbers = #tpu.dot_dimension_numbers<[1], [0], [0], [1], [0, 0, 1, 1], [], []>} : vector<8x288xbf16>, vector<288x32xbf16>, vector<8x32xf32> -> vector<8x32xf32>
    %8 = vector.broadcast %1 : vector<1x32xf32> to vector<8x32xf32>
    %9 = arith.addf %7, %8 : vector<8x32xf32>
    %cst_8 = arith.constant 0.000000e+00 : f32
    %10 = vector.broadcast %cst_8 : f32 to vector<8x32xf32>
    %11 = arith.subf %10, %5 : vector<8x32xf32>
    %12 = math.exp %11 : vector<8x32xf32>
    %cst_9 = arith.constant 1.000000e+00 : f32
    %13 = vector.broadcast %cst_9 : f32 to vector<8x32xf32>
    %14 = arith.addf %13, %12 : vector<8x32xf32>
    %15 = tpu.reciprocal %14 {approx = true} : vector<8x32xf32> -> vector<8x32xf32>
    %cst_10 = arith.constant 0.000000e+00 : f32
    %16 = vector.broadcast %cst_10 : f32 to vector<8x32xf32>
    %17 = arith.subf %16, %9 : vector<8x32xf32>
    %18 = math.exp %17 : vector<8x32xf32>
    %cst_11 = arith.constant 1.000000e+00 : f32
    %19 = vector.broadcast %cst_11 : f32 to vector<8x32xf32>
    %20 = arith.addf %19, %18 : vector<8x32xf32>
    %21 = tpu.reciprocal %20 {approx = true} : vector<8x32xf32> -> vector<8x32xf32>
    %c0_12 = arith.constant 0 : index
    %c0_13 = arith.constant 0 : index
    %22 = vector.load %arg1[%c0_12, %c0_13] : memref<8x288xbf16, #tpu.memory_space<vmem>>, vector<8x32xbf16>
    %23 = arith.extf %22 : vector<8x32xbf16> to vector<8x32xf32>
    %c0_14 = arith.constant 0 : index
    %c0_15 = arith.constant 0 : index
    %24 = vector.load %arg2[%c0_14, %c0_15] : memref<8x288xbf16, #tpu.memory_space<vmem>>, vector<8x32xbf16>
    %25 = arith.extf %24 : vector<8x32xbf16> to vector<8x32xf32>
    %26 = arith.mulf %15, %23 : vector<8x32xf32>
    %27 = arith.mulf %21, %25 : vector<8x32xf32>
    %28 = arith.addf %26, %27 : vector<8x32xf32>
    %29 = arith.truncf %28 : vector<8x32xf32> to vector<8x32xbf16>
    %c0_16 = arith.constant 0 : index
    %c0_17 = arith.constant 0 : index
    %30 = vector.load %arg5[%c0_16, %c0_17] : memref<8x288xbf16, #tpu.memory_space<vmem>>, vector<8x32xbf16>
    tpu.vector_store %arg5[%c0_16, %c0_17], %29 {strides = array<i32>} : memref<8x288xbf16, #tpu.memory_space<vmem>>, vector<8x32xbf16>,
    %c0_18 = arith.constant 0 : index
    %c32 = arith.constant 32 : index
    %31 = vector.load %arg1[%c0_18, %c32] : memref<8x288xbf16, #tpu.memory_space<vmem>>, vector<8x32xbf16>
    %32 = arith.extf %31 : vector<8x32xbf16> to vector<8x32xf32>
    %c0_19 = arith.constant 0 : index
    %c32_20 = arith.constant 32 : index
    %33 = vector.load %arg2[%c0_19, %c32_20] : memref<8x288xbf16, #tpu.memory_space<vmem>>, vector<8x32xbf16>
    %34 = arith.extf %33 : vector<8x32xbf16> to vector<8x32xf32>
    %35 = arith.mulf %15, %32 : vector<8x32xf32>
    %36 = arith.mulf %21, %34 : vector<8x32xf32>
    %37 = arith.addf %35, %36 : vector<8x32xf32>
    %38 = arith.truncf %37 : vector<8x32xf32> to vector<8x32xbf16>
    %c0_21 = arith.constant 0 : index
    %c32_22 = arith.constant 32 : index
    %39 = vector.load %arg5[%c0_21, %c32_22] : memref<8x288xbf16, #tpu.memory_space<vmem>>, vector<8x32xbf16>
    tpu.vector_store %arg5[%c0_21, %c32_22], %38 {strides = array<i32>} : memref<8x288xbf16, #tpu.memory_space<vmem>>, vector<8x32xbf16>,
    %c0_23 = arith.constant 0 : index
    %c64 = arith.constant 64 : index
    %40 = vector.load %arg1[%c0_23, %c64] : memref<8x288xbf16, #tpu.memory_space<vmem>>, vector<8x32xbf16>
    %41 = arith.extf %40 : vector<8x32xbf16> to vector<8x32xf32>
    %c0_24 = arith.constant 0 : index
    %c64_25 = arith.constant 64 : index
    %42 = vector.load %arg2[%c0_24, %c64_25] : memref<8x288xbf16, #tpu.memory_space<vmem>>, vector<8x32xbf16>
    %43 = arith.extf %42 : vector<8x32xbf16> to vector<8x32xf32>
    %44 = arith.mulf %15, %41 : vector<8x32xf32>
    %45 = arith.mulf %21, %43 : vector<8x32xf32>
    %46 = arith.addf %44, %45 : vector<8x32xf32>
    %47 = arith.truncf %46 : vector<8x32xf32> to vector<8x32xbf16>
    %c0_26 = arith.constant 0 : index
    %c64_27 = arith.constant 64 : index
    %48 = vector.load %arg5[%c0_26, %c64_27] : memref<8x288xbf16, #tpu.memory_space<vmem>>, vector<8x32xbf16>
    tpu.vector_store %arg5[%c0_26, %c64_27], %47 {strides = array<i32>} : memref<8x288xbf16, #tpu.memory_space<vmem>>, vector<8x32xbf16>,
    %c0_28 = arith.constant 0 : index
    %c96 = arith.constant 96 : index
    %49 = vector.load %arg1[%c0_28, %c96] : memref<8x288xbf16, #tpu.memory_space<vmem>>, vector<8x32xbf16>
    %50 = arith.extf %49 : vector<8x32xbf16> to vector<8x32xf32>
    %c0_29 = arith.constant 0 : index
    %c96_30 = arith.constant 96 : index
    %51 = vector.load %arg2[%c0_29, %c96_30] : memref<8x288xbf16, #tpu.memory_space<vmem>>, vector<8x32xbf16>
    %52 = arith.extf %51 : vector<8x32xbf16> to vector<8x32xf32>
    %53 = arith.mulf %15, %50 : vector<8x32xf32>
    %54 = arith.mulf %21, %52 : vector<8x32xf32>
    %55 = arith.addf %53, %54 : vector<8x32xf32>
    %56 = arith.truncf %55 : vector<8x32xf32> to vector<8x32xbf16>
    %c0_31 = arith.constant 0 : index
    %c96_32 = arith.constant 96 : index
    %57 = vector.load %arg5[%c0_31, %c96_32] : memref<8x288xbf16, #tpu.memory_space<vmem>>, vector<8x32xbf16>
    tpu.vector_store %arg5[%c0_31, %c96_32], %56 {strides = array<i32>} : memref<8x288xbf16, #tpu.memory_space<vmem>>, vector<8x32xbf16>,
    %c0_33 = arith.constant 0 : index
    %c128 = arith.constant 128 : index
    %58 = vector.load %arg1[%c0_33, %c128] : memref<8x288xbf16, #tpu.memory_space<vmem>>, vector<8x32xbf16>
    %59 = arith.extf %58 : vector<8x32xbf16> to vector<8x32xf32>
    %c0_34 = arith.constant 0 : index
    %c128_35 = arith.constant 128 : index
    %60 = vector.load %arg2[%c0_34, %c128_35] : memref<8x288xbf16, #tpu.memory_space<vmem>>, vector<8x32xbf16>
    %61 = arith.extf %60 : vector<8x32xbf16> to vector<8x32xf32>
    %62 = arith.mulf %15, %59 : vector<8x32xf32>
    %63 = arith.mulf %21, %61 : vector<8x32xf32>
    %64 = arith.addf %62, %63 : vector<8x32xf32>
    %65 = arith.truncf %64 : vector<8x32xf32> to vector<8x32xbf16>
    %c0_36 = arith.constant 0 : index
    %c128_37 = arith.constant 128 : index
    %66 = vector.load %arg5[%c0_36, %c128_37] : memref<8x288xbf16, #tpu.memory_space<vmem>>, vector<8x32xbf16>
    tpu.vector_store %arg5[%c0_36, %c128_37], %65 {strides = array<i32>} : memref<8x288xbf16, #tpu.memory_space<vmem>>, vector<8x32xbf16>,
    %c0_38 = arith.constant 0 : index
    %c160 = arith.constant 160 : index
    %67 = vector.load %arg1[%c0_38, %c160] : memref<8x288xbf16, #tpu.memory_space<vmem>>, vector<8x32xbf16>
    %68 = arith.extf %67 : vector<8x32xbf16> to vector<8x32xf32>
    %c0_39 = arith.constant 0 : index
    %c160_40 = arith.constant 160 : index
    %69 = vector.load %arg2[%c0_39, %c160_40] : memref<8x288xbf16, #tpu.memory_space<vmem>>, vector<8x32xbf16>
    %70 = arith.extf %69 : vector<8x32xbf16> to vector<8x32xf32>
    %71 = arith.mulf %15, %68 : vector<8x32xf32>
    %72 = arith.mulf %21, %70 : vector<8x32xf32>
    %73 = arith.addf %71, %72 : vector<8x32xf32>
    %74 = arith.truncf %73 : vector<8x32xf32> to vector<8x32xbf16>
    %c0_41 = arith.constant 0 : index
    %c160_42 = arith.constant 160 : index
    %75 = vector.load %arg5[%c0_41, %c160_42] : memref<8x288xbf16, #tpu.memory_space<vmem>>, vector<8x32xbf16>
    tpu.vector_store %arg5[%c0_41, %c160_42], %74 {strides = array<i32>} : memref<8x288xbf16, #tpu.memory_space<vmem>>, vector<8x32xbf16>,
    %c0_43 = arith.constant 0 : index
    %c192 = arith.constant 192 : index
    %76 = vector.load %arg1[%c0_43, %c192] : memref<8x288xbf16, #tpu.memory_space<vmem>>, vector<8x32xbf16>
    %77 = arith.extf %76 : vector<8x32xbf16> to vector<8x32xf32>
    %c0_44 = arith.constant 0 : index
    %c192_45 = arith.constant 192 : index
    %78 = vector.load %arg2[%c0_44, %c192_45] : memref<8x288xbf16, #tpu.memory_space<vmem>>, vector<8x32xbf16>
    %79 = arith.extf %78 : vector<8x32xbf16> to vector<8x32xf32>
    %80 = arith.mulf %15, %77 : vector<8x32xf32>
    %81 = arith.mulf %21, %79 : vector<8x32xf32>
    %82 = arith.addf %80, %81 : vector<8x32xf32>
    %83 = arith.truncf %82 : vector<8x32xf32> to vector<8x32xbf16>
    %c0_46 = arith.constant 0 : index
    %c192_47 = arith.constant 192 : index
    %84 = vector.load %arg5[%c0_46, %c192_47] : memref<8x288xbf16, #tpu.memory_space<vmem>>, vector<8x32xbf16>
    tpu.vector_store %arg5[%c0_46, %c192_47], %83 {strides = array<i32>} : memref<8x288xbf16, #tpu.memory_space<vmem>>, vector<8x32xbf16>,
    %c0_48 = arith.constant 0 : index
    %c224 = arith.constant 224 : index
    %85 = vector.load %arg1[%c0_48, %c224] : memref<8x288xbf16, #tpu.memory_space<vmem>>, vector<8x32xbf16>
    %86 = arith.extf %85 : vector<8x32xbf16> to vector<8x32xf32>
    %c0_49 = arith.constant 0 : index
    %c224_50 = arith.constant 224 : index
    %87 = vector.load %arg2[%c0_49, %c224_50] : memref<8x288xbf16, #tpu.memory_space<vmem>>, vector<8x32xbf16>
    %88 = arith.extf %87 : vector<8x32xbf16> to vector<8x32xf32>
    %89 = arith.mulf %15, %86 : vector<8x32xf32>
    %90 = arith.mulf %21, %88 : vector<8x32xf32>
    %91 = arith.addf %89, %90 : vector<8x32xf32>
    %92 = arith.truncf %91 : vector<8x32xf32> to vector<8x32xbf16>
    %c0_51 = arith.constant 0 : index
    %c224_52 = arith.constant 224 : index
    %93 = vector.load %arg5[%c0_51, %c224_52] : memref<8x288xbf16, #tpu.memory_space<vmem>>, vector<8x32xbf16>
    tpu.vector_store %arg5[%c0_51, %c224_52], %92 {strides = array<i32>} : memref<8x288xbf16, #tpu.memory_space<vmem>>, vector<8x32xbf16>,
    %c0_53 = arith.constant 0 : index
    %c256 = arith.constant 256 : index
    %94 = vector.load %arg1[%c0_53, %c256] : memref<8x288xbf16, #tpu.memory_space<vmem>>, vector<8x32xbf16>
    %95 = arith.extf %94 : vector<8x32xbf16> to vector<8x32xf32>
    %c0_54 = arith.constant 0 : index
    %c256_55 = arith.constant 256 : index
    %96 = vector.load %arg2[%c0_54, %c256_55] : memref<8x288xbf16, #tpu.memory_space<vmem>>, vector<8x32xbf16>
    %97 = arith.extf %96 : vector<8x32xbf16> to vector<8x32xf32>
    %98 = arith.mulf %15, %95 : vector<8x32xf32>
    %99 = arith.mulf %21, %97 : vector<8x32xf32>
    %100 = arith.addf %98, %99 : vector<8x32xf32>
    %101 = arith.truncf %100 : vector<8x32xf32> to vector<8x32xbf16>
    %c0_56 = arith.constant 0 : index
    %c256_57 = arith.constant 256 : index
    %102 = vector.load %arg5[%c0_56, %c256_57] : memref<8x288xbf16, #tpu.memory_space<vmem>>, vector<8x32xbf16>
    tpu.vector_store %arg5[%c0_56, %c256_57], %101 {strides = array<i32>} : memref<8x288xbf16, #tpu.memory_space<vmem>>, vector<8x32xbf16>,
    return
  }
  func.func @transform_0(%arg0: i32) -> (i32, i32) {
    %c0_i32 = arith.constant 0 : i32
    %c0_i32_0 = arith.constant 0 : i32
    return %arg0, %c0_i32 : i32, i32
  }
  func.func @transform_1(%arg0: i32) -> (i32, i32) {
    %c0_i32 = arith.constant 0 : i32
    %c0_i32_0 = arith.constant 0 : i32
    return %arg0, %c0_i32 : i32, i32
  }
  func.func @transform_2(%arg0: i32) -> (i32, i32) {
    %c0_i32 = arith.constant 0 : i32
    %c0_i32_0 = arith.constant 0 : i32
    %c0_i32_1 = arith.constant 0 : i32
    return %c0_i32, %c0_i32_0 : i32, i32
  }
  func.func @transform_3(%arg0: i32) -> (i32, i32) {
    %c0_i32 = arith.constant 0 : i32
    %c0_i32_0 = arith.constant 0 : i32
    %c0_i32_1 = arith.constant 0 : i32
    return %c0_i32, %c0_i32_0 : i32, i32
  }
  func.func @transform_4(%arg0: i32) -> (i32, i32) {
    %c0_i32 = arith.constant 0 : i32
    %c0_i32_0 = arith.constant 0 : i32
    return %arg0, %c0_i32 : i32, i32
  }
}

</mosaic_0001>

<bundles_post_ra>
// kernel: tpu_custom_call.1
= control target key start
LH: loop header
LB: loop body
LE: loop exit
PB: predicated region body
PF: predicated region fallthrough
CT: control target
= control target key end

     0   :  { %9 = vsyncpa [#allocation3], 0  ;;  %s1221_s0 = inlined_call_operand.vmem [shape: bf16[16,288], index: 0, kind: input, shape index: {}]   ;;  %s1222_s1 = inlined_call_operand.vmem [shape: bf16[16,288], index: 1, kind: input, shape index: {}]   ;;  %s1223_s2 = inlined_call_operand.vmem [shape: bf16[288,32], index: 2, kind: input, shape index: {}]   ;;  %s1224_s3 = inlined_call_operand.vmem [shape: f32[1,32], index: 3, kind: input, shape index: {}]   ;;  %s1225_s4 = inlined_call_operand.hbm [shape: bf16[16,288], index: 4, kind: output, shape index: {}]  }
   0x1   :  { %11 = vsyncpa [#allocation3 + $0x1], 0  ;;  %s1006_s15 = smov 0   ;;  %s1008_s16 = smov 0  }
   0x2   :  { %s1010_s17 = smov 0   ;;  %s1012_s18 = smov 0  }
   0x3 LB: > { %s1027_s19 = sadd.s32 4294967295, %s976_s18   ;;  %s729_s20 = sadd.s32 4294967294, %s976_s18   ;;  %s976_s18 = sphi %s1012_s18, %s1231_s18   ;;  %s972_s17 = sphi %s1010_s17, %s1230_s17   ;;  %s968_s16 = sphi %s1008_s16, %s1229_s16   ;;  %s964_s15 = sphi %s1006_s15, %s1228_s15  }
   0x4   : > { %s1031_s21 = sadd.s32 1, %s976_s18   ;;  %s118_s22 = sadd.s32 1, %s972_s17 }
   0x5   : > { %s115_s23 = ssub.s32 %s976_s18, %s1031_s21  ;;  %p128_p0 = scmp.ne.s32.totalorder %s972_s17, %s968_s16 }
   0x6   : > { %p116_p1 = scmp.eq.s32.totalorder %s115_s23, 0  ;;  %p129_p2 = scmp.eq.s32.totalorder %s1027_s19, 1 }
   0x7   : > { %p134_p3 = scmp.ne.s32.totalorder %s968_s16, %s964_s15  ;;  %p135_p4 = scmp.eq.s32.totalorder %s729_s20, 1 }
   0x8   : > { %s1042_s24 = scalar_select %p116_p1, %s972_s17, %s118_s22  }
   0x9   : > { %p1044_p5 = por %p129_p2, %p128_p0  ;;  %p1048_p6 = por %p135_p4, %p134_p3 }
   0xa   : > { %p732_p7 = scmp.ge.s32.totalorder %s976_s18, 1  ;;  %p175_p8 = scmp.lt.s32.totalorder %s976_s18, 3 }
   0xc   : > { %p176_p9 = pnand %p732_p7, %p175_p8 }
   0xd   : > { %p206_p10 = scmp.lt.s32.totalorder (!%p176_p9), %s1027_s19, 1  ;;  %s978_s6 = smov (!%p176_p9), 64  }
   0xe   : > { %179 = sbr.rel (%p176_p9) target bundleno = 349 (0x15d), region = 36  ;;  %s979_s9 = smov (!%p176_p9), 96  }
   0xf   : > { %s980_s10 = smov (!%p176_p9), 32   ;;  %s832_s29 = smul.u32 (!%p176_p9), 12, %s1027_s19 }
  0x10   : > { %s934_s13 = scalar_lea.hbm (!%p176_p9), %s1225_s4, 24 }
  0x11   : > { %s653_s7 = scalar_lea.hbm (!%p176_p9), %s1225_s4, %s832_s29 }
  0x13   : > { %v819_v0 = vld [vmem:[%s1223_s2 + $0x38] sm:$0xff]  ;;  %v1060_v1 = vld [vmem:[%s1223_s2 + $0x88] sm:$0xff]  ;;  %v818_v3 = vld [vmem:[%s1223_s2 + $0x30] sm:$0xff]  ;;  %s1076_s11 = scalar_select %p206_p10, %s1027_s19, 1  ;;  %vm377_vm0 = vcmask 261120   ;;  %vm492_vm1 = vcmask 257024  }
  0x14   : > { %v827_v2 = vld [vmem:[%s1223_s2 + $0x78] sm:$0xff]  ;;  %381 = vmatpush.bf16.msra.mxu0 %v819_v0  ;;  %413 = vmatpush.bf16.msra.mxu2 %v1060_v1  ;;  %v1073_v4 = vld [vmem:[%s1223_s2 + $0x80] sm:$0xff]  ;;  %v826_v5 = vld [vmem:[%s1223_s2 + $0x70] sm:$0xff]  ;;  %vm514_vm2 = vcmask 519424   ;;  %vm536_vm3 = vcmask 781824   ;;  %vm558_vm4 = vcmask 1044224  }
  0x15   : > { %435 = vmatpush.bf16.msra.mxu3 %v819_v0  ;;  %394 = vmatpush.bf16.msra.mxu1 %v827_v2  ;;  %s831_s14 = smul.u32 12, %s1076_s11  ;;  %v817_v6 = vld [vmem:[%s1223_s2 + $0x28] sm:$0xff]  ;;  %v816_v10 = vld [vmem:[%s1223_s2 + $0x20] sm:$0xff]  ;;  %v815_v13 = vld [vmem:[%s1223_s2 + $0x18] sm:$0xff] }
  0x16   : > { %v825_v8 = vld [vmem:[%s1223_s2 + $0x68] sm:$0xff]  ;;  %v824_v12 = vld [vmem:[%s1223_s2 + $0x60] sm:$0xff]  ;;  %v823_v14 = vld [vmem:[%s1223_s2 + $0x58] sm:$0xff] }
  0x17   : > { %s1089_s28 = scalar_lea.vmem %s1221_s0, %s831_s14  ;;  %v814_v15 = vld [vmem:[%s1223_s2 + $0x10] sm:$0xff]  ;;  %s1117_s27 = scalar_lea.vmem %s1222_s1, %s831_s14  ;;  %v813_v31 = vld [vmem:[%s1223_s2 + $0x8] sm:$0xff]  ;;  %v812_v41 = vld [vmem:[%s1223_s2] sm:$0xff] }
  0x18   : > { %382 = vmatpush.bf16.msra.mxu0 %v818_v3  ;;  %414 = vmatpush.bf16.msra.mxu2 %v1073_v4  ;;  %v1092_v7 = vld [vmem:[%s1089_s28 + $0x4] sm:$0xff]   ;;  %v822_v26 = vld [vmem:[%s1223_s2 + $0x50] sm:$0xff]  ;;  %v905_v60 = vld [vmem:[%s1224_s3] ss:$0 sm:$0xff]  ;;  %s203_s14 = sand.u32 1, %s968_s16  }
  0x19   : > { %436 = vmatpush.bf16.msra.mxu3 %v818_v3  ;;  %395 = vmatpush.bf16.msra.mxu1 %v826_v5  ;;  %v263_v9 = vunpack.c.h.b16 %v1092_v7  ;;  %v516_v16 = vld [vmem:[%s1089_s28] sm:$0xff]   ;;  %v821_v37 = vld [vmem:[%s1223_s2 + $0x48] sm:$0xff]  ;;  %s642_s19 = scalar_lea.sflag [#allocation3], %s203_s14 }
  0x1a   : > { %v518_v17 = vld [vmem:[%s1117_s27] sm:$0xff]   ;;  %v517_v19 = vunpack.c.l.bf16 %v516_v16  ;;  %v591_v33 = vunpack.c.h.bf16 %v516_v16 }
  0x1b   : > { %v266_v11 = vpack.c.b16 %v263_v9, %v263_v9  ;;  %v494_v18 = vld [vmem:[%s1089_s28] sm:$0xff]   ;;  %v519_v20 = vunpack.c.l.bf16 %v518_v17  ;;  %v593_v34 = vunpack.c.h.bf16 %v518_v17 }
  0x1c   : > { %448 = vmatpush.bf16.msrb.mxu2 %v827_v2  ;;  %383 = vmatpush.bf16.msra.mxu0 %v817_v6  ;;  %v495_v21 = vunpack.c.l.bf16 %v494_v18  ;;  %v496_v22 = vld [vmem:[%s1117_s27] sm:$0xff]   ;;  %v570_v39 = vunpack.c.h.bf16 %v494_v18 }
  0x1d   : > { %437 = vmatpush.bf16.msra.mxu3 %v817_v6  ;;  %396 = vmatpush.bf16.msra.mxu1 %v825_v8  ;;  %v538_v23 = vld [vmem:[%s1089_s28] sm:$0xff]   ;;  %v497_v25 = vunpack.c.l.bf16 %v496_v22  ;;  %v885_v27 = vpack.i.bf16 %v519_v20, %v517_v19  ;;  %v572_v40 = vunpack.c.h.bf16 %v496_v22  ;;  %v890_v43 = vpack.i.bf16 %v593_v34, %v591_v33  ;;  %v632_v33 = vld [vmem:[%s1089_s28 + $0x8] sm:$0xf] }
  0x1e   : > { %807 = vmatmul.msk.bf16.vlgmr.msra.gmra.mxu2 %vm377_vm0, %v266_v11  ;;  %v540_v24 = vld [vmem:[%s1117_s27] sm:$0xff]   ;;  %v539_v28 = vunpack.c.l.bf16 %v538_v23  ;;  %v612_v44 = vunpack.c.h.bf16 %v538_v23 }
  0x1f   : > { %v541_v29 = vunpack.c.l.bf16 %v540_v24  ;;  %v875_v30 = vpack.i.bf16 %v497_v25, %v495_v21  ;;  %v254_v32 = vld [vmem:[%s1089_s28] sm:$0xff]  ;;  %886 = vrot.lane.b32.xlu1 %v885_v27, %s978_s6  ;;  %v614_v45 = vunpack.c.h.bf16 %v540_v24  ;;  %v880_v49 = vpack.i.bf16 %v572_v40, %v570_v39 }
  0x20   : > { %449 = vmatpush.bf16.msrb.mxu2 %v826_v5  ;;  %384 = vmatpush.bf16.msra.mxu0 %v816_v10  ;;  %v420_v36 = vld [vmem:[%s1117_s27] sm:$0xff]  ;;  %v261_v38 = vunpack.c.l.b16 %v254_v32  ;;  %v262_v46 = vunpack.c.h.b16 %v254_v32 }
  0x21   : > { %438 = vmatpush.bf16.msra.mxu3 %v816_v10  ;;  %397 = vmatpush.bf16.msra.mxu1 %v824_v12  ;;  %v895_v35 = vpack.i.bf16 %v541_v29, %v539_v28  ;;  %v424_v42 = vunpack.c.l.b16 %v420_v36  ;;  %v820_v47 = vld [vmem:[%s1223_s2 + $0x40] sm:$0xff]  ;;  %v425_v50 = vunpack.c.h.b16 %v420_v36  ;;  %v900_v52 = vpack.i.bf16 %v614_v45, %v612_v44 }
  0x22   : > { %876 = vrot.lane.b32.xlu0 %v875_v30, %s979_s9  ;;  %v264_v48 = vpack.c.b16 %v261_v38, %v261_v38  ;;  %v265_v53 = vpack.c.b16 %v262_v46, %v262_v46  ;;  %v1151_v55 = vld [vmem:[%s1117_s27 + $0x4] sm:$0xff]   ;;  %v486_v27 = vld [vmem:[%s1117_s27] sm:$0xf]  ;;  %v561_v38 = vunpack.c.l.bf16 %v1092_v7  ;;  %v633_v46 = vunpack.c.l.bf16 %v632_v33 }
  0x23   : > { %896 = vrot.lane.b32.xlu2 %v895_v35, %s980_s10  ;;  %v427_v51 = vpack.c.b16 %v424_v42, %v424_v42  ;;  %v428_v54 = vpack.c.b16 %v425_v50, %v425_v50  ;;  %v426_v56 = vunpack.c.h.b16 %v1151_v55  ;;  %v563_v40 = vunpack.c.l.bf16 %v1151_v55 }
  0x24   : > { %450 = vmatpush.bf16.msrb.mxu2 %v825_v8  ;;  %385 = vmatpush.bf16.msra.mxu0 %v815_v13  ;;  %v487_v42 = vunpack.c.l.bf16 %v486_v27 }
  0x25   : > { %439 = vmatpush.bf16.msra.mxu3 %v815_v13  ;;  %398 = vmatpush.bf16.msra.mxu1 %v823_v14  ;;  %v429_v57 = vpack.c.b16 %v426_v56, %v426_v56 }
  0x27   : > { %891 = vrot.lane.b32.xlu1 %v890_v43, %s978_s6 }
  0x28   : > { %451 = vmatpush.bf16.msrb.mxu2 %v824_v12  ;;  %386 = vmatpush.bf16.msra.mxu0 %v814_v15 }
  0x29   : > { %440 = vmatpush.bf16.msra.mxu3 %v814_v15  ;;  %399 = vmatpush.bf16.msra.mxu1 %v822_v26 }
  0x2a   : > { %881 = vrot.lane.b32.xlu0 %v880_v49, %s979_s9 }
  0x2b   : > { %901 = vrot.lane.b32.xlu2 %v900_v52, %s980_s10  ;;  %v634_v52 = vld [vmem:[%s1117_s27 + $0x8] sm:$0xf] }
  0x2c   : > { %452 = vmatpush.bf16.msrb.mxu2 %v823_v14  ;;  %387 = vmatpush.bf16.msra.mxu0 %v813_v31 }
  0x2d   : > { %441 = vmatpush.bf16.msra.mxu3 %v813_v31  ;;  %400 = vmatpush.bf16.msra.mxu1 %v821_v37 }
  0x30   : > { %453 = vmatpush.bf16.msrb.mxu2 %v822_v26  ;;  %388 = vmatpush.bf16.msra.mxu0 %v812_v41  ;;  %v484_v26 = vld [vmem:[%s1089_s28] sm:$0xf]  ;;  %s830_s28 = smul.u32 12, %s203_s14 }
  0x31   : > { %442 = vmatpush.bf16.msra.mxu3 %v812_v41  ;;  %401 = vmatpush.bf16.msra.mxu1 %v820_v47  ;;  %v485_v41 = vunpack.c.l.bf16 %v484_v26 }
  0x32   : > { %s1170_s27 = scalar_lea.vmem [#allocation2], %s830_s28 }
  0x33   : > { %389 = vmatmul.bf16.vlgmr.msra.gmra.mxu0 %v264_v48  ;;  %s655_s8 = sshll.u32 %s1170_s27, 4  ;;  %s656_s8 = int_to_ptr.vmem [resolvable:$true] %s655_s8 }
  0x34   : > { %454 = vmatpush.bf16.msrb.mxu2 %v821_v37  ;;  %467 = vmatpush.bf16.msrb.mxu0 %v1060_v1 }
  0x35   : > { %443 = vmatmul.bf16.vlgmr.msra.gmra.mxu3 %v427_v51  ;;  %402 = vmatmul.bf16.vlgmr.msra.gmra.mxu1 %v265_v53 }
  0x38   : > { %455 = vmatpush.bf16.msrb.mxu2 %v820_v47  ;;  %468 = vmatpush.bf16.msrb.mxu0 %v1073_v4 }
  0x3b   : > { %456 = vmatmul.bf16.vlgmr.msrb.gmra.mxu2 %v428_v54 }
  0x43   : > { %808 = vmatmul.msk.bf16.vlgmr.msrb.gmra.mxu0 %vm377_vm0, %v429_v57 }
  0x7d   : > { %v897_v19 = vpop.permute.xlu2 %896 }
  0x7e   : > { %v899_v28 = vunpack.i.h.bf16 %v897_v19  ;;  %v898_v39 = vunpack.i.l.bf16 %v897_v19 }
  0x85   : > { %v902_v31 = vpop.permute.xlu2 %901 }
  0x86   : > { %v903_v44 = vunpack.i.l.bf16 %v902_v31  ;;  %v904_v50 = vunpack.i.h.bf16 %v902_v31 }
  0x91   : > { %v887_v20 = vpop.permute.xlu1 %886 }
  0x92   : > { %v888_v29 = vunpack.i.l.bf16 %v887_v20  ;;  %v889_v35 = vunpack.i.h.bf16 %v887_v20 }
  0x94   : > { %v877_v18 = vpop.permute.xlu0 %876 }
  0x95   : > { %v878_v30 = vunpack.i.l.bf16 %v877_v18  ;;  %v879_v43 = vunpack.i.h.bf16 %v877_v18 }
  0x99   : > { %v892_v32 = vpop.permute.xlu1 %891 }
  0x9a   : > { %v893_v45 = vunpack.i.l.bf16 %v892_v32  ;;  %v894_v51 = vunpack.i.h.bf16 %v892_v32 }
  0x9c   : > { %v882_v25 = vpop.permute.xlu0 %881 }
  0x9d   : > { %v884_v36 = vunpack.i.h.bf16 %v882_v25  ;;  %v883_v37 = vunpack.i.l.bf16 %v882_v25 }
  0xa1   : > { %v416_v58 = vpop.f32.mrf.mxu2 }
  0xa9   : > { %v418_v59 = vpop.f32.mrf.mxu2 }
  0xb0   : > { %v390_v61 = vpop.f32.mrf.mxu0 }
  0xb1   : > { %v391_v62 = vadd.f32 %v905_v60, %v390_v61 }
  0xb2   : > { %v403_v63 = vpop.f32.mrf.mxu1 }
  0xb3   : > { %v404_v0 = vadd.f32 %v403_v63, %v391_v62  ;;  %v635_v62 = vunpack.c.l.bf16 %v634_v52 }
  0xb5   : > { %v417_v1 = vadd.f32 %v416_v58, %v404_v0 }
  0xb7   : > { %v474_v3 = vsub.f32 0.0, %v417_v1 }
  0xb8   : > { %v444_v2 = vpop.f32.mrf.mxu3  ;;  %v392_v4 = vpop.f32.mrf.mxu0 }
  0xb9   : > { %v445_v5 = vadd.f32 %v905_v60, %v444_v2  ;;  %v475_v9 = vmul.f32 1.442695, %v474_v3 }
  0xba   : > { %v405_v6 = vpop.f32.mrf.mxu1 }
  0xbb   : > { %906 = vpow2.f32 %v475_v9 }
  0xbe   : > { %v457_v8 = vpop.f32.mrf.mxu2 }
  0xbf   : > { %v458_v10 = vadd.f32 %v457_v8, %v445_v5 }
  0xc0   : > { %v446_v11 = vpop.f32.mrf.mxu3  ;;  %v470_v12 = vpop.f32.mrf.mxu0 }
  0xc1   : > { %v471_v13 = vadd.f32 %v470_v12, %v458_v10  ;;  %v907_v17 = vpop.eup %906 }
  0xc2   : > { %v477_v22 = vadd.f32 1.0, %v907_v17 }
  0xc3   : > { %v479_v14 = vsub.f32 0.0, %v471_v13 }
  0xc5   : > { %v480_v16 = vmul.f32 1.442695, %v479_v14 }
  0xc6   : > { %v459_v15 = vpop.f32.mrf.mxu2 }
  0xc7   : > { %908 = vpow2.f32 %v480_v16 }
  0xc8   : > { %v472_v21 = vpop.f32.mrf.mxu0  ;;  %910 = vrcp.f32 %v477_v22 }
  0xcd   : > { %v909_v23 = vpop.eup %908 }
  0xce   : > { %v482_v24 = vadd.f32 1.0, %v909_v23  ;;  %v911_v34 = vpop.eup %910 }
  0xcf   : > { %v524_v48 = vmul.f32 %v911_v34, %v888_v29  ;;  %v502_v49 = vmul.f32 %v911_v34, %v878_v30  ;;  %v577_v53 = vmul.f32 %v911_v34, %v883_v37  ;;  %v564_v55 = vmul.f32 %v911_v34, %v561_v38 }
  0xd0   : > { %912 = vrcp.f32 %v482_v24  ;;  %v488_v59 = vmul.f32 %v911_v34, %v485_v41  ;;  %v546_v63 = vmul.f32 %v911_v34, %v898_v39  ;;  %v619_v12 = vmul.f32 %v911_v34, %v903_v44 }
  0xd1   : > { %v636_v13 = vmul.f32 %v911_v34, %v633_v46  ;;  %v598_v15 = vmul.f32 %v911_v34, %v893_v45 }
  0xd6   : > { %v913_v47 = vpop.eup %912 }
  0xd7   : > { %v582_v54 = vmul.f32 %v913_v47, %v884_v36  ;;  %v529_v7 = vmul.f32 %v913_v47, %v889_v35  ;;  %v507_v56 = vmul.f32 %v913_v47, %v879_v43  ;;  %v565_v57 = vmul.f32 %v913_v47, %v563_v40 }
  0xd8   : > { %v489_v58 = vmul.f32 %v913_v47, %v487_v42  ;;  %v624_v3 = vmul.f32 %v913_v47, %v904_v50  ;;  %v551_v6 = vmul.f32 %v913_v47, %v899_v28  ;;  %v603_v8 = vmul.f32 %v913_v47, %v894_v51 }
  0xd9   : > { %v583_v60 = vadd.f32 %v582_v54, %v577_v53  ;;  %v530_v61 = vadd.f32 %v529_v7, %v524_v48  ;;  %v508_v0 = vadd.f32 %v507_v56, %v502_v49  ;;  %v566_v1 = vadd.f32 %v565_v57, %v564_v55 }
  0xda   : > { %v490_v2 = vadd.f32 %v489_v58, %v488_v59  ;;  %v637_v14 = vmul.f32 %v913_v47, %v635_v62  ;;  %v552_v16 = vadd.f32 %v551_v6, %v546_v63  ;;  %v625_v17 = vadd.f32 %v624_v3, %v619_v12 }
  0xdb   : > { %v584_v4 = vpack.c.bf16 %v583_v60, %v583_v60  ;;  %v531_v5 = vpack.c.bf16 %v530_v61, %v530_v61  ;;  %v509_v9 = vpack.c.bf16 %v508_v0, %v508_v0  ;;  %v567_v10 = vpack.c.bf16 %v566_v1, %v566_v1 }
  0xdc   : > { %v491_v11 = vpack.c.bf16 %v490_v2, %v490_v2  ;;  %v638_v18 = vadd.f32 %v637_v14, %v636_v13  ;;  %v604_v19 = vadd.f32 %v603_v8, %v598_v15  ;;  %v553_v21 = vpack.c.bf16 %v552_v16, %v552_v16 }
  0xdd   : > { %586 = vrot.lane.b32.xlu1 %v584_v4, %s980_s10  ;;  %533 = vrot.lane.b32.xlu2 %v531_v5, %s978_s6  ;;  %568 = vst.msk [vmem:[%s1170_s27 + $0x4] sm:$0xf] %vm492_vm1, %v567_v10  ;;  %v626_v22 = vpack.c.bf16 %v625_v17, %v625_v17 }
  0xde   : > { %511 = vrot.lane.b32.xlu0 %v509_v9, %s980_s10  ;;  %493 = vst.msk [vmem:[%s1170_s27] sm:$0xf] %vm492_vm1, %v491_v11  ;;  %v639_v20 = vpack.c.bf16 %v638_v18, %v638_v18  ;;  %v605_v23 = vpack.c.bf16 %v604_v19, %v604_v19 }
  0xe0   : > { %640 = vst.msk [vmem:[%s1170_s27 + $0x8] sm:$0xf] %vm492_vm1, %v639_v20 }
  0xe5   : > { %555 = vrot.lane.b32.xlu1 %v553_v21, %s979_s9  ;;  %628 = vrot.lane.b32.xlu2 %v626_v22, %s979_s9 }
  0xe6   : > { %607 = vrot.lane.b32.xlu0 %v605_v23, %s978_s6  ;;  %s657_s6 = sshll.u32 %s653_s7, 4  ;;  %s658_s6 = int_to_ptr.hbm [resolvable:$true] %s657_s6 }
  0xe7   : > { %s928_s9 = sshra.s32 %s658_s6, 4  ;;  %s929_s9 = int_to_ptr.hbm [resolvable:$true] %s928_s9 }
  0xe8   : > { %s930_s10 = scalar_lea.hbm %s929_s9, 12  ;;  %p935_p0 = scmp.lt.s32.totalorder %s929_s9, %s1225_s4 }
  0xe9   : > { %p931_p11 = scmp.ne.s32.totalorder %s929_s9, %s930_s10  ;;  %p936_p1 = scmp.lt.s32.totalorder %s934_s13, %s930_s10 }
  0xeb   : > { %p932_p12 = pnand %p931_p11, %p1044_p5  ;;  %p937_p2 = por %p936_p1, %p935_p0 }
  0xed   : > { %p933_p13 = pneg %p932_p12 }
  0xef   : > { %p938_p3 = pnand %p937_p2, %p933_p13 }
 0x137   : > { %v534_v24 = vpop.permute.xlu2 %533 }
 0x13f   : > { %v629_v29 = vpop.permute.xlu2 %628 }
 0x14f   : > { %v587_v25 = vpop.permute.xlu1 %586 }
 0x150   : > { %589 = vst.msk [vmem:[%s1170_s27 + $0x4] sm:$0xf] %vm514_vm2, %v587_v25  ;;  %v512_v26 = vpop.permute.xlu0 %511 }
 0x151   : > { %515 = vst.msk [vmem:[%s1170_s27] sm:$0xf] %vm514_vm2, %v512_v26 }
 0x152   : > { %537 = vst.msk [vmem:[%s1170_s27] sm:$0xf] %vm536_vm3, %v534_v24 }
 0x157   : > { %v556_v27 = vpop.permute.xlu1 %555 }
 0x158   : > { %559 = vst.msk [vmem:[%s1170_s27] sm:$0xf] %vm558_vm4, %v556_v27  ;;  %v608_v28 = vpop.permute.xlu0 %607 }
 0x159   : > { %610 = vst.msk [vmem:[%s1170_s27 + $0x4] sm:$0xf] %vm536_vm3, %v608_v28 }
 0x15a   : > { %631 = vst.msk [vmem:[%s1170_s27 + $0x4] sm:$0xf] %vm558_vm4, %v629_v29 }
 0x15b   : > { %941 = shalt.err (!%p938_p3)
}
 0x15c   : > { %833 = dma.vmem_to_hbm [thread:$0]  (%p1044_p5), %s656_s8, 192, %s658_s6, %s642_s19  }
 0x15d PF: > { %p839_p4 = scmp.ge.s32.totalorder %s976_s18, 2  ;;  %s669_s23 = sand.u32 1, %s964_s15  }
 0x15e   : > { %s670_s14 = scalar_lea.sflag [#allocation3], %s669_s23 }
 0x15f   : > { %p836_p7 = pnand %p839_p4, %p1048_p6 }
 0x161   : > { %p837_p8 = pneg %p836_p7 }
 0x163   : > { %959 = dma.done.wait (%p837_p8), %s670_s14, 192  }
 0x164   : > { %961 = vsyncadd (%p837_p8), %s670_s14, 4294967104  ;;  %p14_p9 = scmp.ge.s32.totalorder %s1031_s21, 4   ;;  %s1228_s15 = smov %s968_s16 }
 0x165   : > { %s1229_s16 = smov %s972_s17  ;;  %s1230_s17 = smov %s1042_s24 }
 0x166   : > { %s1231_s18 = smov %s1031_s21  ;;  %16 = sbr.rel (!%p14_p9) target bundleno = 3 (0x3), region = 74 }
 0x16b   :  { %676 = vsyncpa [#allocation3], 1 }
 0x16c   :  { %678 = vsyncpa [#allocation3 + $0x1], 1 }

</bundles_post_ra>
